<compile_context>
chip_gen: v7x
topology: tpu7x:2x2x1
jax: 0.10.0
libtpu: 0.0.40
codegen_flags: <defaults>
</compile_context>

<pallas_src>
import functools

import jax
import jax.numpy as jnp
from jax.experimental import pallas as pl
from jax.experimental.pallas import tpu as pltpu


def _mlp_kernel(x_ref, w1_ref, b1_ref, w2_ref, b2_ref, w3t_ref, b3_ref, o_ref):
    x = x_ref[...]                                    # (3, TB)
    w1 = w1_ref[...]                                  # (32, 3)

    # ---- Linear(3 -> 32) + ReLU: K=3, done as 3 VPU broadcast-MACs. ----
    h1 = (w1[:, 0:1] * x[0:1, :]
          + w1[:, 1:2] * x[1:2, :]
          + w1[:, 2:3] * x[2:3, :]
          + b1_ref[...])                              # (32, TB)
    h1 = jnp.maximum(h1, 0.0)

    # ---- Linear(32 -> 64) + ReLU: the only layer worth the MXU. ----
    h2 = jnp.dot(w2_ref[...], h1,
                 preferred_element_type=jnp.float32) + b2_ref[...]   # (64, TB)
    h2 = jnp.maximum(h2, 0.0)

    # ---- Linear(64 -> 2): only 2 output rows -> VPU mul + sublane reduce. ----
    w3t = w3t_ref[...]                                # (64, 2)
    r0 = jnp.sum(w3t[:, 0:1] * h2, axis=0, keepdims=True)            # (1, TB)
    r1 = jnp.sum(w3t[:, 1:2] * h2, axis=0, keepdims=True)            # (1, TB)
    o_ref[...] = jnp.concatenate([r0, r1], axis=0) + b3_ref[...]     # (2, TB)


def _round_up(n, m):
    return ((n + m - 1) // m) * m


@functools.partial(jax.jit, static_argnames=("tile_b",))
def generator_forward(x, params, *, tile_b=2048):
    """x: (B, 3) float32 -> (B, 2) float32 (PyTorch nn.Linear convention)."""
    B = x.shape[0]

    # Batch goes on the lane axis inside the kernel.
    xt = x.T                                              # (3, B)

    # Pad the batch to a lane-dense multiple of 128 and pick the tile size.
    tb = min(tile_b, _round_up(B, 128))
    bp = _round_up(B, tb)
    if bp != B:
        xt = jnp.pad(xt, ((0, 0), (0, bp - B)))

    # Kernel-layout params (weights row-major over out features; w3 kept as
    # (in, out) so its per-output columns slice without a relayout).
    w1 = params["w1"]                                     # (32, 3)
    b1 = params["b1"].reshape(32, 1)
    w2 = params["w2"]                                     # (64, 32)
    b2 = params["b2"].reshape(64, 1)
    w3t = params["w3"].T                                  # (64, 2)
    b3 = params["b3"].reshape(2, 1)

    const = lambda i: (0, 0)
    out_t = pl.pallas_call(
        _mlp_kernel,
        out_shape=jax.ShapeDtypeStruct((2, bp), jnp.float32),
        grid=(bp // tb,),
        in_specs=[
            pl.BlockSpec((3, tb), lambda i: (0, i)),      # x tile (pipelined)
            pl.BlockSpec((32, 3), const),                 # weights stay VMEM-resident
            pl.BlockSpec((32, 1), const),
            pl.BlockSpec((64, 32), const),
            pl.BlockSpec((64, 1), const),
            pl.BlockSpec((64, 2), const),
            pl.BlockSpec((2, 1), const),
        ],
        out_specs=pl.BlockSpec((2, tb), lambda i: (0, i)),
        compiler_params=pltpu.CompilerParams(
            dimension_semantics=("parallel",),            # megacore on v7x
            vmem_limit_bytes=32 * 1024 * 1024,
        ),
    )(xt, w1, b1, w2, b2, w3t, b3)

    return out_t[:, :B].T                                 # (B, 2)


def init_params(key):
    """PyTorch default Linear init: U(-1/sqrt(fan_in), +1/sqrt(fan_in)).
    Weights in PyTorch convention: (out_features, in_features); bias (out,)."""
    def linear(k, fan_in, fan_out):
        kw, kb = jax.random.split(k)
        bound = 1.0 / float(fan_in) ** 0.5
        w = jax.random.uniform(kw, (fan_out, fan_in), jnp.float32, -bound, bound)
        b = jax.random.uniform(kb, (fan_out,), jnp.float32, -bound, bound)
        return w, b

    k1, k2, k3 = jax.random.split(key, 3)
    w1, b1 = linear(k1, 3, 32)
    w2, b2 = linear(k2, 32, 64)
    w3, b3 = linear(k3, 64, 2)
    return {"w1": w1, "b1": b1, "w2": w2, "b2": b2, "w3": w3, "b3": b3}


def _reference_forward(x, params):
    h1 = jnp.maximum(x @ params["w1"].T + params["b1"], 0.0)
    h2 = jnp.maximum(h1 @ params["w2"].T + params["b2"], 0.0)
    return h2 @ params["w3"].T + params["b3"]


if __name__ == "__main__":
    key = jax.random.PRNGKey(0)
    k_params, k_x = jax.random.split(key)

    params = init_params(k_params)
    x = jax.random.normal(k_x, (8, 3), dtype=jnp.float32)   # batch=8, in_features=3

    out = generator_forward(x, params)
    out = jax.block_until_ready(out)

    ref = _reference_forward(x, params)
    assert out.shape == (8, 2), out.shape
    assert jnp.allclose(out, ref, atol=1e-5, rtol=1e-5), "mismatch vs reference"

    print("KERNEL_OK")
</pallas_src>

<mosaic_0001>
module attributes {stable_mosaic.version = 11 : i64} {
  func.func @_mlp_kernel(%arg0: i32, %arg1: memref<3x128xf32, #tpu.memory_space<vmem>>, %arg2: memref<32x3xf32, #tpu.memory_space<vmem>>, %arg3: memref<32x1xf32, #tpu.memory_space<vmem>>, %arg4: memref<64x32xf32, #tpu.memory_space<vmem>>, %arg5: memref<64x1xf32, #tpu.memory_space<vmem>>, %arg6: memref<64x2xf32, #tpu.memory_space<vmem>>, %arg7: memref<2x1xf32, #tpu.memory_space<vmem>>, %arg8: memref<2x128xf32, #tpu.memory_space<vmem>>) attributes {dimension_semantics = [#tpu.dimension_semantics<parallel>], iteration_bounds = array<i64: 1>, scalar_prefetch = 0 : i64, scratch_operands = 0 : i64, tpu.core_type = #tpu.core_type<tc>, window_params = [{transform_indices = @transform_0, window_bounds = array<i64: 3, 128>}, {pipeline_mode = #tpu.pipeline_mode<synchronous>, transform_indices = @transform_1, window_bounds = array<i64: 32, 3>}, {pipeline_mode = #tpu.pipeline_mode<synchronous>, transform_indices = @transform_2, window_bounds = array<i64: 32, 1>}, {pipeline_mode = #tpu.pipeline_mode<synchronous>, transform_indices = @transform_3, window_bounds = array<i64: 64, 32>}, {pipeline_mode = #tpu.pipeline_mode<synchronous>, transform_indices = @transform_4, window_bounds = array<i64: 64, 1>}, {pipeline_mode = #tpu.pipeline_mode<synchronous>, transform_indices = @transform_5, window_bounds = array<i64: 64, 2>}, {pipeline_mode = #tpu.pipeline_mode<synchronous>, transform_indices = @transform_6, window_bounds = array<i64: 2, 1>}, {transform_indices = @transform_7, window_bounds = array<i64: 2, 128>}]} {
    %c0 = arith.constant 0 : index
    %c0_0 = arith.constant 0 : index
    %0 = vector.load %arg1[%c0, %c0_0] : memref<3x128xf32, #tpu.memory_space<vmem>>, vector<3x128xf32>
    %c0_1 = arith.constant 0 : index
    %c0_2 = arith.constant 0 : index
    %1 = vector.load %arg2[%c0_1, %c0_2] : memref<32x3xf32, #tpu.memory_space<vmem>>, vector<32x3xf32>
    %2 = vector.extract_strided_slice %1 {offsets = [0, 0], sizes = [32, 1], strides = [1, 1]} : vector<32x3xf32> to vector<32x1xf32>
    %3 = vector.extract_strided_slice %0 {offsets = [0, 0], sizes = [1, 128], strides = [1, 1]} : vector<3x128xf32> to vector<1x128xf32>
    %4 = vector.broadcast %2 : vector<32x1xf32> to vector<32x128xf32>
    %5 = vector.broadcast %3 : vector<1x128xf32> to vector<32x128xf32>
    %6 = arith.mulf %4, %5 : vector<32x128xf32>
    %7 = vector.extract_strided_slice %1 {offsets = [0, 1], sizes = [32, 1], strides = [1, 1]} : vector<32x3xf32> to vector<32x1xf32>
    %8 = vector.extract_strided_slice %0 {offsets = [1, 0], sizes = [1, 128], strides = [1, 1]} : vector<3x128xf32> to vector<1x128xf32>
    %9 = vector.broadcast %7 : vector<32x1xf32> to vector<32x128xf32>
    %10 = vector.broadcast %8 : vector<1x128xf32> to vector<32x128xf32>
    %11 = arith.mulf %9, %10 : vector<32x128xf32>
    %12 = arith.addf %6, %11 : vector<32x128xf32>
    %13 = vector.extract_strided_slice %1 {offsets = [0, 2], sizes = [32, 1], strides = [1, 1]} : vector<32x3xf32> to vector<32x1xf32>
    %14 = vector.extract_strided_slice %0 {offsets = [2, 0], sizes = [1, 128], strides = [1, 1]} : vector<3x128xf32> to vector<1x128xf32>
    %15 = vector.broadcast %13 : vector<32x1xf32> to vector<32x128xf32>
    %16 = vector.broadcast %14 : vector<1x128xf32> to vector<32x128xf32>
    %17 = arith.mulf %15, %16 : vector<32x128xf32>
    %18 = arith.addf %12, %17 : vector<32x128xf32>
    %c0_3 = arith.constant 0 : index
    %c0_4 = arith.constant 0 : index
    %19 = vector.load %arg3[%c0_3, %c0_4] : memref<32x1xf32, #tpu.memory_space<vmem>>, vector<32x1xf32>
    %20 = vector.broadcast %19 : vector<32x1xf32> to vector<32x128xf32>
    %21 = arith.addf %18, %20 : vector<32x128xf32>
    %cst = arith.constant 0.000000e+00 : f32
    %22 = vector.broadcast %cst : f32 to vector<32x128xf32>
    %23 = arith.maximumf %21, %22 : vector<32x128xf32>
    %c0_5 = arith.constant 0 : index
    %c0_6 = arith.constant 0 : index
    %24 = vector.load %arg4[%c0_5, %c0_6] : memref<64x32xf32, #tpu.memory_space<vmem>>, vector<64x32xf32>
    %cst_7 = arith.constant dense<0.000000e+00> : vector<64x128xf32>
    %25 = tpu.matmul %24, %23, %cst_7 {dimension_numbers = #tpu.dot_dimension_numbers<[1], [0], [0], [1], [0, 0, 1, 1], [], []>} : vector<64x32xf32>, vector<32x128xf32>, vector<64x128xf32> -> vector<64x128xf32>
    %c0_8 = arith.constant 0 : index
    %c0_9 = arith.constant 0 : index
    %26 = vector.load %arg5[%c0_8, %c0_9] : memref<64x1xf32, #tpu.memory_space<vmem>>, vector<64x1xf32>
    %27 = vector.broadcast %26 : vector<64x1xf32> to vector<64x128xf32>
    %28 = arith.addf %25, %27 : vector<64x128xf32>
    %cst_10 = arith.constant 0.000000e+00 : f32
    %29 = vector.broadcast %cst_10 : f32 to vector<64x128xf32>
    %30 = arith.maximumf %28, %29 : vector<64x128xf32>
    %c0_11 = arith.constant 0 : index
    %c0_12 = arith.constant 0 : index
    %31 = vector.load %arg6[%c0_11, %c0_12] : memref<64x2xf32, #tpu.memory_space<vmem>>, vector<64x2xf32>
    %32 = vector.extract_strided_slice %31 {offsets = [0, 0], sizes = [64, 1], strides = [1, 1]} : vector<64x2xf32> to vector<64x1xf32>
    %33 = vector.broadcast %32 : vector<64x1xf32> to vector<64x128xf32>
    %34 = arith.mulf %33, %30 : vector<64x128xf32>
    %cst_13 = arith.constant dense<0.000000e+00> : vector<128xf32>
    %35 = vector.multi_reduction <add>, %34, %cst_13 [0] : vector<64x128xf32> to vector<128xf32>
    %36 = vector.shape_cast %35 : vector<128xf32> to vector<1x128xf32>
    %37 = vector.extract_strided_slice %31 {offsets = [0, 1], sizes = [64, 1], strides = [1, 1]} : vector<64x2xf32> to vector<64x1xf32>
    %38 = vector.broadcast %37 : vector<64x1xf32> to vector<64x128xf32>
    %39 = arith.mulf %38, %30 : vector<64x128xf32>
    %cst_14 = arith.constant dense<0.000000e+00> : vector<128xf32>
    %40 = vector.multi_reduction <add>, %39, %cst_14 [0] : vector<64x128xf32> to vector<128xf32>
    %41 = vector.shape_cast %40 : vector<128xf32> to vector<1x128xf32>
    %42 = tpu.concatenate %36, %41 in 0 : vector<1x128xf32>, vector<1x128xf32> -> vector<2x128xf32>
    %c0_15 = arith.constant 0 : index
    %c0_16 = arith.constant 0 : index
    %43 = vector.load %arg7[%c0_15, %c0_16] : memref<2x1xf32, #tpu.memory_space<vmem>>, vector<2x1xf32>
    %44 = vector.broadcast %43 : vector<2x1xf32> to vector<2x128xf32>
    %45 = arith.addf %42, %44 : vector<2x128xf32>
    %c0_17 = arith.constant 0 : index
    %c0_18 = arith.constant 0 : index
    %46 = vector.load %arg8[%c0_17, %c0_18] : memref<2x128xf32, #tpu.memory_space<vmem>>, vector<2x128xf32>
    tpu.vector_store %arg8[%c0_17, %c0_18], %45 {strides = array<i32>} : memref<2x128xf32, #tpu.memory_space<vmem>>, vector<2x128xf32>,
    return
  }
  func.func @transform_0(%arg0: i32) -> (i32, i32) {
    %c0_i32 = arith.constant 0 : i32
    %c0_i32_0 = arith.constant 0 : i32
    return %c0_i32, %arg0 : i32, i32
  }
  func.func @transform_1(%arg0: i32) -> (i32, i32) {
    %c0_i32 = arith.constant 0 : i32
    %c0_i32_0 = arith.constant 0 : i32
    %c0_i32_1 = arith.constant 0 : i32
    return %c0_i32, %c0_i32_0 : i32, i32
  }
  func.func @transform_2(%arg0: i32) -> (i32, i32) {
    %c0_i32 = arith.constant 0 : i32
    %c0_i32_0 = arith.constant 0 : i32
    %c0_i32_1 = arith.constant 0 : i32
    return %c0_i32, %c0_i32_0 : i32, i32
  }
  func.func @transform_3(%arg0: i32) -> (i32, i32) {
    %c0_i32 = arith.constant 0 : i32
    %c0_i32_0 = arith.constant 0 : i32
    %c0_i32_1 = arith.constant 0 : i32
    return %c0_i32, %c0_i32_0 : i32, i32
  }
  func.func @transform_4(%arg0: i32) -> (i32, i32) {
    %c0_i32 = arith.constant 0 : i32
    %c0_i32_0 = arith.constant 0 : i32
    %c0_i32_1 = arith.constant 0 : i32
    return %c0_i32, %c0_i32_0 : i32, i32
  }
  func.func @transform_5(%arg0: i32) -> (i32, i32) {
    %c0_i32 = arith.constant 0 : i32
    %c0_i32_0 = arith.constant 0 : i32
    %c0_i32_1 = arith.constant 0 : i32
    return %c0_i32, %c0_i32_0 : i32, i32
  }
  func.func @transform_6(%arg0: i32) -> (i32, i32) {
    %c0_i32 = arith.constant 0 : i32
    %c0_i32_0 = arith.constant 0 : i32
    %c0_i32_1 = arith.constant 0 : i32
    return %c0_i32, %c0_i32_0 : i32, i32
  }
  func.func @transform_7(%arg0: i32) -> (i32, i32) {
    %c0_i32 = arith.constant 0 : i32
    %c0_i32_0 = arith.constant 0 : i32
    return %c0_i32, %arg0 : i32, i32
  }
}

</mosaic_0001>

<bundles_post_ra>
// kernel: generator_forward.1
= control target key start
LH: loop header
LB: loop body
LE: loop exit
PB: predicated region body
PF: predicated region fallthrough
CT: control target
= control target key end

     0   :  { %v548_v0 = vmov 2   ;;  %v549_v1 = vmov 1   ;;  %v550_v5 = vmov 0   ;;  %vm203_vm0 = vcmask 261120   ;;  %s717_s1 = inlined_call_operand.vmem [shape: f32[32,3], index: 1, kind: input, shape index: {}]   ;;  %s718_s2 = inlined_call_operand.vmem [shape: f32[32,1], index: 2, kind: input, shape index: {}]   ;;  %s719_s4 = inlined_call_operand.vmem [shape: f32[64,1], index: 4, kind: input, shape index: {}]   ;;  %s720_s5 = inlined_call_operand.vmem [shape: f32[64,2], index: 5, kind: input, shape index: {}]   ;;  %s721_s3 = inlined_call_operand.vmem [shape: f32[64,32], index: 3, kind: input, shape index: {}]   ;;  %s722_s6 = inlined_call_operand.vmem [shape: f32[2,1], index: 6, kind: input, shape index: {}]   ;;  %s723_s0 = inlined_call_operand.vmem [shape: f32[3,128], index: 0, kind: input, shape index: {}]   ;;  %s724_s7 = inlined_call_operand.vmem [shape: f32[2,128], index: 7, kind: output, shape index: {}]  }
   0x1   :  { %533 = vset.pattern.permute.xlu0 %v548_v0  ;;  %532 = vset.pattern.permute.xlu1 %v549_v1  ;;  %v27_v2 = vld [vmem:[%s717_s1] sm:$0xff]  ;;  %v29_v3 = vld [vmem:[%s717_s1 + $0x10] sm:$0xff]  ;;  %v28_v4 = vld [vmem:[%s717_s1 + $0x8] sm:$0xff]  ;;  %v51_v35 = vlaneseq  ;;  %vm463_vm1 = vcmask 1040384  }
   0x2   :  { %88 = vperm.xlu0 %533, %v27_v2   ;;  %60 = vperm.xlu1 %532, %v27_v2   ;;  %v30_v6 = vld [vmem:[%s717_s1 + $0x18] sm:$0xff]  ;;  %v116_v7 = vld [vmem:[%s718_s2 + $0x8] sm:$0xff]  ;;  %v155_v8 = vld [vmem:[%s719_s4] sm:$0xff] }
   0x3   :  { %v157_v9 = vld [vmem:[%s719_s4 + $0x10] sm:$0xff]  ;;  %v341_v10 = vld [vmem:[%s720_s5] sm:$0xff]  ;;  %v344_v14 = vld [vmem:[%s720_s5 + $0x18] sm:$0xff]  ;;  %v52_v37 = vshrl.u32 %v51_v35, 7 }
   0x4   :  { %v115_v11 = vld [vmem:[%s718_s2] sm:$0xff]  ;;  %v343_v12 = vld [vmem:[%s720_s5 + $0x10] sm:$0xff]  ;;  %v118_v15 = vld [vmem:[%s718_s2 + $0x18] sm:$0xff] }
   0x5   :  { %v117_v13 = vld [vmem:[%s718_s2 + $0x10] sm:$0xff]  ;;  %v156_v17 = vld [vmem:[%s719_s4 + $0x8] sm:$0xff]  ;;  %v158_v18 = vld [vmem:[%s719_s4 + $0x18] sm:$0xff]  ;;  %v53_v39 = vsub.s32 0, %v52_v37  ;;  %v77_v41 = vsub.s32 1, %v52_v37  ;;  %v105_v44 = vsub.s32 2, %v52_v37 }
   0x6   :  { %96 = vperm.xlu0 %533, %v29_v3   ;;  %64 = vperm.xlu1 %532, %v28_v4   ;;  %v161_v16 = vld [vmem:[%s719_s4 + $0x30] sm:$0xff]  ;;  %v147_v19 = vld [vmem:[%s721_s3] sm:$0xff]  ;;  %v342_v21 = vld [vmem:[%s720_s5 + $0x8] sm:$0xff] }
   0x7   :  { %v151_v20 = vld [vmem:[%s721_s3 + $0x20] sm:$0xff]  ;;  %505 = vmatprep.mubr.msk.f32.mxu0 %vm203_vm0, %v147_v19  ;;  %v346_v23 = vld [vmem:[%s720_s5 + $0x28] sm:$0xff]  ;;  %v347_v25 = vld [vmem:[%s720_s5 + $0x30] sm:$0xff] }
   0x8   :  { %511 = vmatprep.mubr.msk.f32.mxu1 %vm203_vm0, %v151_v20  ;;  %v345_v22 = vld [vmem:[%s720_s5 + $0x20] sm:$0xff]  ;;  %v348_v26 = vld [vmem:[%s720_s5 + $0x38] sm:$0xff]  ;;  %v160_v27 = vld [vmem:[%s719_s4 + $0x28] sm:$0xff] }
   0x9   :  { %v159_v24 = vld [vmem:[%s719_s4 + $0x20] sm:$0xff]  ;;  %v162_v28 = vld [vmem:[%s719_s4 + $0x38] sm:$0xff] }
   0xa   :  { %537 = vset.pattern.permute.xlu0 %v550_v5  ;;  %534 = vset.pattern.permute.xlu1 %v548_v0  ;;  %v465_v29 = vld [vmem:[%s722_s6] sm:$0x3] }
   0xb   :  { %33 = vperm.xlu0 %537, %v27_v2   ;;  %92 = vperm.xlu1 %534, %v28_v4   ;;  %v26_v42 = vld [vmem:[%s723_s0] sm:$0x7] }
   0xc   :  { %v54_v45 = vrot.slane %v26_v42, %v53_v39  ;;  %v78_v46 = vrot.slane %v26_v42, %v77_v41  ;;  %v106_v50 = vrot.slane %v26_v42, %v105_v44 }
   0xf   :  { %38 = vperm.xlu0 %537, %v28_v4   ;;  %535 = vset.pattern.permute.xlu1 %v550_v5 }
  0x10   :  { %43 = vperm.xlu1 %535, %v29_v3  }
  0x13   :  { %48 = vperm.xlu0 %537, %v30_v6  }
  0x14   :  { %536 = vset.pattern.permute.xlu1 %v549_v1 }
  0x15   :  { %68 = vperm.xlu1 %536, %v29_v3  }
  0x17   :  { %126 = vperm.xlu0 %537, %v116_v7  }
  0x19   :  { %72 = vperm.xlu1 %536, %v30_v6  }
  0x1b   :  { %165 = vperm.xlu0 %537, %v155_v8  }
  0x1d   :  { %538 = vset.pattern.permute.xlu1 %v548_v0 }
  0x1e   :  { %100 = vperm.xlu1 %538, %v30_v6  }
  0x1f   :  { %175 = vperm.xlu0 %537, %v157_v9  }
  0x22   :  { %539 = vset.pattern.permute.xlu1 %v550_v5 }
  0x23   :  { %351 = vperm.xlu0 %537, %v341_v10   ;;  %121 = vperm.xlu1 %539, %v115_v11  }
  0x27   :  { %361 = vperm.xlu0 %537, %v343_v12   ;;  %131 = vperm.xlu1 %539, %v117_v13  }
  0x2b   :  { %366 = vperm.xlu0 %537, %v344_v14   ;;  %136 = vperm.xlu1 %539, %v118_v15  }
  0x2f   :  { %195 = vperm.xlu0 %537, %v161_v16   ;;  %170 = vperm.xlu1 %539, %v156_v17  }
  0x33   :  { %180 = vperm.xlu1 %539, %v158_v18   ;;  %545 = vset.pattern.permute.xlu0 %v549_v1 }
  0x34   :  { %411 = vperm.xlu0 %545, %v341_v10  }
  0x37   :  { %356 = vperm.xlu1 %539, %v342_v21  }
  0x38   :  { %427 = vperm.xlu0 %545, %v345_v22  }
  0x3b   :  { %540 = vset.pattern.permute.xlu1 %v549_v1 }
  0x3c   :  { %415 = vperm.xlu1 %540, %v342_v21   ;;  %431 = vperm.xlu0 %545, %v346_v23   ;;  %v148_v21 = vld [vmem:[%s721_s3 + $0x8] sm:$0xff] }
  0x40   :  { %541 = vset.pattern.permute.xlu1 %v550_v5  ;;  %435 = vperm.xlu0 %545, %v347_v25  }
  0x41   :  { %185 = vperm.xlu1 %541, %v159_v24   ;;  %v153_v24 = vld [vmem:[%s721_s3 + $0x30] sm:$0xff] }
  0x44   :  { %439 = vperm.xlu0 %545, %v348_v26  }
  0x45   :  { %542 = vset.pattern.permute.xlu1 %v549_v1 }
  0x46   :  { %419 = vperm.xlu1 %542, %v343_v12  }
  0x48   :  { %547 = vset.pattern.permute.xlu0 %v550_v5 }
  0x4a   :  { %543 = vset.pattern.permute.xlu1 %v550_v5 }
  0x4b   :  { %190 = vperm.xlu1 %543, %v160_v27  }
  0x4f   :  { %544 = vset.pattern.permute.xlu1 %v549_v1 }
  0x50   :  { %423 = vperm.xlu1 %544, %v344_v14  }
  0x54   :  { %546 = vset.pattern.permute.xlu1 %v550_v5 }
  0x55   :  { %371 = vperm.xlu1 %546, %v345_v22   ;;  %v152_v22 = vld [vmem:[%s721_s3 + $0x28] sm:$0xff] }
  0x59   :  { %200 = vperm.xlu1 %546, %v162_v28  }
  0x5d   :  { %376 = vperm.xlu1 %546, %v346_v23   ;;  %v149_v23 = vld [vmem:[%s721_s3 + $0x10] sm:$0xff] }
  0x61   :  { %381 = vperm.xlu1 %546, %v347_v25   ;;  %v150_v25 = vld [vmem:[%s721_s3 + $0x18] sm:$0xff] }
  0x65   :  { %386 = vperm.xlu1 %546, %v348_v26   ;;  %v154_v26 = vld [vmem:[%s721_s3 + $0x38] sm:$0xff] }
  0x69   :  { %468 = vperm.xlu1 %546, %v465_v29  }
  0x81   :  { %v61_v30 = vpop.permute.xlu1 %60  ;;  %v89_v31 = vpop.permute.xlu0 %88 }
  0x82   :  { %v79_v53 = vmul.f32 %v78_v46, %v61_v30  ;;  %v107_v55 = vmul.f32 %v106_v50, %v89_v31 }
  0x85   :  { %v65_v32 = vpop.permute.xlu1 %64  ;;  %v97_v33 = vpop.permute.xlu0 %96 }
  0x86   :  { %v80_v51 = vmul.f32 %v78_v46, %v65_v32  ;;  %v109_v6 = vmul.f32 %v106_v50, %v97_v33 }
  0x8a   :  { %v93_v34 = vpop.permute.xlu1 %92  ;;  %v34_v36 = vpop.permute.xlu0 %33 }
  0x8b   :  { %v55_v52 = vmul.f32 %v54_v45, %v34_v36  ;;  %v108_v57 = vmul.f32 %v106_v50, %v93_v34 }
  0x8d   :  { %v83_v56 = vadd.f32 %v79_v53, %v55_v52 }
  0x8e   :  { %v39_v40 = vpop.permute.xlu0 %38 }
  0x8f   :  { %v44_v38 = vpop.permute.xlu1 %43  ;;  %v56_v47 = vmul.f32 %v54_v45, %v39_v40  ;;  %v111_v0 = vadd.f32 %v107_v55, %v83_v56 }
  0x90   :  { %v57_v62 = vmul.f32 %v54_v45, %v44_v38 }
  0x91   :  { %v84_v54 = vadd.f32 %v80_v51, %v56_v47 }
  0x92   :  { %v49_v48 = vpop.permute.xlu0 %48 }
  0x93   :  { %v112_v61 = vadd.f32 %v108_v57, %v84_v54  ;;  %v58_v2 = vmul.f32 %v54_v45, %v49_v48 }
  0x94   :  { %v69_v43 = vpop.permute.xlu1 %68 }
  0x95   :  { %v81_v60 = vmul.f32 %v78_v46, %v69_v43 }
  0x96   :  { %v127_v59 = vpop.permute.xlu0 %126 }
  0x97   :  { %v140_v63 = vadd.f32 %v127_v59, %v112_v61  ;;  %v85_v3 = vadd.f32 %v81_v60, %v57_v62 }
  0x98   :  { %v73_v49 = vpop.permute.xlu1 %72 }
  0x99   :  { %v82_v4 = vmul.f32 %v78_v46, %v73_v49  ;;  %v144_v7 = vmax.f32 %v140_v63, 0.0  ;;  %v113_v13 = vadd.f32 %v109_v6, %v85_v3 }
  0x9a   :  { %v166_v29 = vpop.permute.xlu0 %165 }
  0x9b   :  { %v86_v11 = vadd.f32 %v82_v4, %v58_v2 }
  0x9d   :  { %v101_v58 = vpop.permute.xlu1 %100 }
  0x9e   :  { %v110_v8 = vmul.f32 %v106_v50, %v101_v58  ;;  %v176_v32 = vpop.permute.xlu0 %175 }
  0xa0   :  { %v114_v15 = vadd.f32 %v110_v8, %v86_v11 }
  0xa2   :  { %v122_v1 = vpop.permute.xlu1 %121  ;;  %v352_v34 = vpop.permute.xlu0 %351 }
  0xa3   :  { %v139_v5 = vadd.f32 %v122_v1, %v111_v0 }
  0xa5   :  { %v143_v9 = vmax.f32 %v139_v5, 0.0 }
  0xa6   :  { %v132_v10 = vpop.permute.xlu1 %131  ;;  %v362_v36 = vpop.permute.xlu0 %361 }
  0xa7   :  { %v517_v12 = vpack.c.bf16 %v144_v7, %v143_v9  ;;  %v141_v14 = vadd.f32 %v132_v10, %v113_v13 }
  0xa9   :  { %518 = vmatprep.subr.bf16.mxu0 %v517_v12  ;;  %525 = vmatprep.subr.bf16.mxu1 %v517_v12  ;;  %v145_v18 = vmax.f32 %v141_v14, 0.0 }
  0xaa   :  { %v137_v16 = vpop.permute.xlu1 %136  ;;  %520 = vmatpush3.bf16.msra.mxu0 %v517_v12  ;;  %527 = vmatpush3.bf16.msra.mxu1 %v517_v12  ;;  %v367_v38 = vpop.permute.xlu0 %366 }
  0xab   :  { %v142_v17 = vadd.f32 %v137_v16, %v114_v15 }
  0xad   :  { %v146_v19 = vmax.f32 %v142_v17, 0.0 }
  0xae   :  { %v171_v27 = vpop.permute.xlu1 %170  ;;  %v196_v40 = vpop.permute.xlu0 %195 }
  0xaf   :  { %v521_v20 = vpack.c.bf16 %v146_v19, %v145_v18 }
  0xb1   :  { %522 = vmatprep.subr.bf16.mxu0 %v521_v20  ;;  %526 = vmatprep.subr.bf16.mxu1 %v521_v20 }
  0xb2   :  { %524 = vmatpush3.bf16.msra.mxu0 %v521_v20  ;;  %528 = vmatpush3.bf16.msra.mxu1 %v521_v20  ;;  %v181_v28 = vpop.permute.xlu1 %180 }
  0xb3   :  { %v412_v42 = vpop.permute.xlu0 %411 }
  0xb5   :  { %506 = vmatmul.mubr.msk.f32.vlgmr.msra.gmra.mrb[0].mxu0 %vm203_vm0, %v148_v21  ;;  %512 = vmatmul.mubr.msk.f32.vlgmr.msra.gmra.mrb[0].mxu1 %vm203_vm0, %v152_v22 }
  0xb6   :  { %508 = vmatprep.mubr.msk.f32.mxu0 %vm203_vm0, %v149_v23  ;;  %514 = vmatprep.mubr.msk.f32.mxu1 %vm203_vm0, %v153_v24  ;;  %v357_v30 = vpop.permute.xlu1 %356 }
  0xb7   :  { %v428_v50 = vpop.permute.xlu0 %427 }
  0xb9   :  { %509 = vmatmul.mubr.msk.f32.gmra.mrb[2].mxu0 %vm203_vm0, %v150_v25  ;;  %515 = vmatmul.mubr.msk.f32.gmra.mrb[2].mxu1 %vm203_vm0, %v154_v26 }
  0xbb   :  { %v416_v31 = vpop.permute.xlu1 %415  ;;  %v432_v3 = vpop.permute.xlu0 %431 }
  0xbf   :  { %v436_v18 = vpop.permute.xlu0 %435 }
  0xc0   :  { %v186_v33 = vpop.permute.xlu1 %185 }
  0xc5   :  { %v420_v35 = vpop.permute.xlu1 %419 }
  0xca   :  { %v191_v37 = vpop.permute.xlu1 %190 }
  0xcf   :  { %v424_v39 = vpop.permute.xlu1 %423 }
  0xd4   :  { %v372_v41 = vpop.permute.xlu1 %371 }
  0xd8   :  { %v201_v49 = vpop.permute.xlu1 %200 }
  0xdc   :  { %v377_v2 = vpop.permute.xlu1 %376 }
  0xe0   :  { %v382_v17 = vpop.permute.xlu1 %381 }
 0x188   :  { %v507_v43 = vpop.f32.mrb[0].mxu0  ;;  %v513_v44 = vpop.f32.mrb[0].mxu1 }
 0x189   :  { %v300_v45 = vadd.f32 %v507_v43, %v171_v27  ;;  %v294_v46 = vpop.f32.mrb[1].mxu0  ;;  %v314_v47 = vpop.f32.mrb[1].mxu1  ;;  %v320_v4 = vadd.f32 %v513_v44, %v191_v37 }
 0x18a   :  { %v295_v48 = vadd.f32 %v294_v46, %v166_v29  ;;  %v315_v61 = vadd.f32 %v314_v47, %v186_v33  ;;  %v387_v33 = vpop.permute.xlu1 %386 }
 0x18b   :  { %v334_v51 = vmax.f32 %v300_v45, 0.0  ;;  %v338_v11 = vmax.f32 %v320_v4, 0.0 }
 0x18c   :  { %v333_v52 = vmax.f32 %v295_v48, 0.0  ;;  %v510_v53 = vpop.f32.mrb[2].mxu0  ;;  %v516_v54 = vpop.f32.mrb[2].mxu1  ;;  %v337_v7 = vmax.f32 %v315_v61, 0.0 }
 0x18d   :  { %v390_v55 = vmul.f32 %v357_v30, %v334_v51  ;;  %v443_v56 = vmul.f32 %v416_v31, %v334_v51  ;;  %v304_v57 = vpop.f32.mrb[3].mxu0  ;;  %v324_v58 = vpop.f32.mrb[3].mxu1  ;;  %v310_v62 = vadd.f32 %v510_v53, %v181_v28  ;;  %v330_v12 = vadd.f32 %v516_v54, %v201_v49 }
 0x18e   :  { %v389_v59 = vmul.f32 %v352_v34, %v333_v52  ;;  %v442_v60 = vmul.f32 %v412_v42, %v333_v52  ;;  %v305_v63 = vadd.f32 %v304_v57, %v176_v32  ;;  %v325_v10 = vadd.f32 %v324_v58, %v196_v40  ;;  %v440_v34 = vpop.permute.xlu0 %439  ;;  %v469_v53 = vpop.permute.xlu1 %468 }
 0x18f   :  { %v336_v6 = vmax.f32 %v310_v62, 0.0  ;;  %v393_v19 = vmul.f32 %v372_v41, %v337_v7  ;;  %v446_v20 = vmul.f32 %v428_v50, %v337_v7  ;;  %v394_v24 = vmul.f32 %v377_v2, %v338_v11 }
 0x190   :  { %v397_v0 = vadd.f32 %v390_v55, %v389_v59  ;;  %v450_v1 = vadd.f32 %v443_v56, %v442_v60  ;;  %v335_v5 = vmax.f32 %v305_v63, 0.0  ;;  %v339_v23 = vmax.f32 %v325_v10, 0.0 }
 0x191   :  { %v392_v13 = vmul.f32 %v367_v38, %v336_v6  ;;  %v445_v14 = vmul.f32 %v424_v39, %v336_v6  ;;  %v447_v25 = vmul.f32 %v432_v3, %v338_v11  ;;  %v340_v26 = vmax.f32 %v330_v12, 0.0 }
 0x192   :  { %v391_v8 = vmul.f32 %v362_v36, %v335_v5  ;;  %v444_v9 = vmul.f32 %v420_v35, %v335_v5  ;;  %v395_v29 = vmul.f32 %v382_v17, %v339_v23  ;;  %v448_v31 = vmul.f32 %v436_v18, %v339_v23 }
 0x193   :  { %v396_v35 = vmul.f32 %v387_v33, %v340_v26  ;;  %v449_v36 = vmul.f32 %v440_v34, %v340_v26 }
 0x194   :  { %v398_v15 = vadd.f32 %v397_v0, %v391_v8  ;;  %v451_v16 = vadd.f32 %v450_v1, %v444_v9 }
 0x196   :  { %v399_v21 = vadd.f32 %v398_v15, %v392_v13  ;;  %v452_v22 = vadd.f32 %v451_v16, %v445_v14 }
 0x198   :  { %v400_v27 = vadd.f32 %v399_v21, %v393_v19  ;;  %v453_v28 = vadd.f32 %v452_v22, %v446_v20 }
 0x19a   :  { %v401_v30 = vadd.f32 %v400_v27, %v394_v24  ;;  %v454_v32 = vadd.f32 %v453_v28, %v447_v25 }
 0x19c   :  { %v402_v37 = vadd.f32 %v401_v30, %v395_v29  ;;  %v455_v38 = vadd.f32 %v454_v32, %v448_v31 }
 0x19e   :  { %v403_v39 = vadd.f32 %v402_v37, %v396_v35  ;;  %v456_v40 = vadd.f32 %v455_v38, %v449_v36 }
 0x1a0   :  { %v404_v41 = vrot.slane %v403_v39, 4  ;;  %v457_v42 = vrot.slane %v456_v40, 4 }
 0x1a2   :  { %v405_v43 = vadd.f32 %v404_v41, %v403_v39  ;;  %v458_v44 = vadd.f32 %v457_v42, %v456_v40 }
 0x1a4   :  { %v406_v45 = vrot.slane %v405_v43, 2  ;;  %v459_v46 = vrot.slane %v458_v44, 2 }
 0x1a6   :  { %v407_v47 = vadd.f32 %v406_v45, %v405_v43  ;;  %v460_v48 = vadd.f32 %v459_v46, %v458_v44 }
 0x1a8   :  { %v408_v49 = vrot.slane %v407_v47, 1  ;;  %v461_v50 = vrot.slane %v460_v48, 1 }
 0x1aa   :  { %v409_v51 = vadd.f32 %v408_v49, %v407_v47  ;;  %v462_v52 = vadd.f32 %v461_v50, %v460_v48 }
 0x1ac   :  { %v464_v54 = vsel %vm463_vm1, %v409_v51, %v462_v52 }
 0x1ad   :  { %v471_v55 = vadd.f32 %v469_v53, %v464_v54 }
 0x1af   :  { %472 = vst [vmem:[%s724_s7] sm:$0x3] %v471_v55 }

</bundles_post_ra>
